<compile_context>
chip_gen: v5e
topology: v5e:2x2
jax: 0.10.0
libtpu: 0.0.40
codegen_flags: <defaults>
</compile_context>

<pallas_src>
import functools

import jax
import jax.numpy as jnp
from jax import lax
from jax.experimental import pallas as pl
from jax.experimental.pallas import tpu as pltpu


_BLOCK_BYTES_TARGET = 2 * 1024 * 1024     # per-input block (2 in x 2 buf = 8 MiB pipeline)
_VMEM_LIMIT_BYTES = 32 * 1024 * 1024      # safe on v5e/v6e/v7x, above every scoped default


def _round_up(x: int, m: int) -> int:
    return ((x + m - 1) // m) * m


def _round_dn(x: int, m: int) -> int:
    return (x // m) * m


def _classfix_kernel(p1_ref, p2_ref, part_ref, *,
                     inv_thr: float, n_total: int, tile_n: int, exp_bf16: bool):
    i = pl.program_id(0)

    p1 = p1_ref[...].astype(jnp.float32)   # [T, C] logits (to be supervised)
    p2 = p2_ref[...].astype(jnp.float32)   # [T, C] logits (pseudo-label source)
    t, c = p1.shape

    # Valid-row mask for the (possibly padded) last tile.
    row = lax.broadcasted_iota(jnp.int32, (t, 1), 0)                # [T, 1]
    valid = (i * tile_n + row) < n_total                            # [T, 1] bool

    # --- softmax(pred2): confidence mask + argmax (pseudo label) ----------
    # Confidence exp stays in f32 so threshold membership matches the f32
    # reference bit-for-bit (no mask flips on borderline rows).
    m2 = jnp.max(p2, axis=-1, keepdims=True)                        # [T, 1]
    denom2 = jnp.sum(jnp.exp(p2 - m2), axis=-1, keepdims=True)      # [T, 1]
    # max softmax prob == 1/denom2;  (1/denom2 >= thr) <=> (denom2 <= 1/thr)
    mask = jnp.where(jnp.logical_and(denom2 <= inv_thr, valid), 1.0, 0.0)

    col = lax.broadcasted_iota(jnp.int32, (t, c), 1)                # [T, C]
    # First index attaining the max (matches torch.max tie-breaking).
    pseudo = jnp.min(jnp.where(p2 == m2, col, c), axis=-1, keepdims=True)

    # --- CrossEntropy(pred1, pseudo_label), reduction='none' --------------
    m1 = jnp.max(p1, axis=-1, keepdims=True)                        # [T, 1]
    x1 = p1 - m1
    if exp_bf16:
        # bf16 EUP exp (v6e/v7x): halves f32 exp pressure; accumulate in f32.
        e1 = jnp.exp(x1.astype(jnp.bfloat16)).astype(jnp.float32)
    else:
        e1 = jnp.exp(x1)
    lse1 = m1 + jnp.log(jnp.sum(e1, axis=-1, keepdims=True))        # [T, 1]
    picked = jnp.sum(jnp.where(col == pseudo, p1, 0.0), axis=-1, keepdims=True)
    # Gate with `where` (not multiply) so garbage padded rows can't inject NaN.
    loss = jnp.where(valid, (lse1 - picked) * mask, 0.0)            # [T, 1]

    # --- single merged per-tile partial output: [loss_sum, mask_sum] -------
    # Packed via iota/where (pure elementwise) -> one write-back DMA per step.
    lane = lax.broadcasted_iota(jnp.int32, (1, 1, 2), 2)
    part_ref[...] = jnp.where(lane == 0, jnp.sum(loss), jnp.sum(mask))


def _auto_tile_n(c: int, itemsize: int) -> int:
    # ~2 MiB per input block; sized purely by bytes (no row cap) so the fixed
    # per-step cost stays negligible even for small class counts.
    tile = _BLOCK_BYTES_TARGET // max(1, c * itemsize)
    return max(16, _round_dn(tile, 16))


def class_fix_loss(pred1, pred2, score_thr=0.95, tile_n=None, exp_bf16=None):
    """Returns (loss_sum, n, mask_mean, num_masked) like ClassFixLoss.forward."""
    assert pred1.shape == pred2.shape and pred1.ndim == 2
    n, c = pred1.shape
    itemsize = jnp.dtype(pred1.dtype).itemsize
    if exp_bf16 is None:
        exp_bf16 = (jnp.dtype(pred1.dtype) == jnp.bfloat16)

    if tile_n is None:
        tile_n = _auto_tile_n(c, itemsize)
    if tile_n >= n:
        # Prefer >= 2 tiles so the "parallel" axis actually feeds both v7x
        # TensorCores; a second grid step is noise on single-TC v5e/v6e.
        half = max(16, _round_up(-(-n // 2), 16))
        tile_n = half if half < n else n
    else:
        tile_n = max(16, _round_dn(tile_n, 16))     # bf16-friendly alignment
    num_tiles = -(-n // tile_n)

    cost = pl.CostEstimate(
        flops=10 * n * c,                            # maxes/subs/sums/selects
        transcendentals=2 * n * c + 2 * n,           # 2 exp passes + log
        bytes_accessed=2 * n * c * itemsize + num_tiles * 8,
    )

    parts = pl.pallas_call(
        functools.partial(_classfix_kernel,
                          inv_thr=1.0 / float(score_thr),
                          n_total=n, tile_n=tile_n, exp_bf16=bool(exp_bf16)),
        out_shape=jax.ShapeDtypeStruct((num_tiles, 1, 2), jnp.float32),
        grid=(num_tiles,),
        in_specs=[
            pl.BlockSpec((tile_n, c), lambda i: (i, 0)),
            pl.BlockSpec((tile_n, c), lambda i: (i, 0)),
        ],
        out_specs=pl.BlockSpec((1, 1, 2), lambda i: (i, 0, 0)),
        compiler_params=pltpu.CompilerParams(
            dimension_semantics=("parallel",),
            vmem_limit_bytes=_VMEM_LIMIT_BYTES),
        cost_estimate=cost,
    )(pred1, pred2)

    loss_parts = parts[:, 0, 0]
    mask_parts = parts[:, 0, 1]
    loss_sum = jnp.sum(loss_parts)
    mask_sum = jnp.sum(mask_parts)
    mask_mean = mask_sum / float(n)
    # Per-tile mask sums are exact small integers; accumulate the count in
    # int32 so it stays exact no matter how large N gets.
    mask_cnt = jnp.sum(jnp.round(mask_parts).astype(jnp.int32))
    return loss_sum, n, mask_mean, mask_cnt


def _reference(pred1, pred2, score_thr=0.95):
    """Pure-JAX reference for validation (same math as the PyTorch module)."""
    soft2 = jax.nn.softmax(pred2, axis=-1)
    max_probs = jnp.max(soft2, axis=-1)
    pseudo = jnp.argmax(soft2, axis=-1)
    mask = (max_probs >= score_thr).astype(jnp.float32)
    logp = jax.nn.log_softmax(pred1, axis=-1)
    ce = -jnp.take_along_axis(logp, pseudo[:, None], axis=-1)[:, 0]
    loss = ce * mask
    return loss.sum(), pred1.shape[0], mask.mean(), int((mask > 0).sum())


if __name__ == "__main__":
    key = jax.random.PRNGKey(0)
    k1, k2, k3, k4, k5, k6 = jax.random.split(key, 6)

    # --- small [N, C] logits, f32, single tile -----------------------------
    N, C = 8, 32
    pred1 = jax.random.normal(k1, (N, C), dtype=jnp.float32)
    # scale pred2 so some rows have confident (>= 0.95) softmax maxima
    pred2 = 4.0 * jax.random.normal(k2, (N, C), dtype=jnp.float32)

    loss_sum, n, mask_mean, mask_cnt = class_fix_loss(pred1, pred2, 0.95)
    jax.block_until_ready((loss_sum, mask_mean, mask_cnt))

    ref_sum, ref_n, ref_mean, ref_cnt = _reference(pred1, pred2, 0.95)
    assert n == ref_n
    assert int(mask_cnt) == ref_cnt
    assert jnp.allclose(loss_sum, ref_sum, rtol=1e-5, atol=1e-5)
    assert jnp.allclose(mask_mean, ref_mean, rtol=1e-6, atol=1e-6)

    # --- auto-tiled path: batch split into >=2 tiles, padded last tile ------
    N1, C1 = 48, 64
    q1 = jax.random.normal(k5, (N1, C1), dtype=jnp.float32)
    q2 = 4.0 * jax.random.normal(k6, (N1, C1), dtype=jnp.float32)
    ls1, n1, mm1, mc1 = class_fix_loss(q1, q2, 0.95)
    jax.block_until_ready((ls1, mm1, mc1))
    r_sum1, r_n1, r_mean1, r_cnt1 = _reference(q1, q2, 0.95)
    assert n1 == r_n1
    assert int(mc1) == r_cnt1
    assert jnp.allclose(ls1, r_sum1, rtol=1e-5, atol=1e-4)
    assert jnp.allclose(mm1, r_mean1, rtol=1e-6, atol=1e-6)

    # --- explicit tiling: multiple N-tiles, padded last tile, bf16 ----------
    N2, C2 = 40, 128
    p1f = jax.random.normal(k3, (N2, C2), dtype=jnp.float32)
    p2f = 4.0 * jax.random.normal(k4, (N2, C2), dtype=jnp.float32)
    p1b = p1f.astype(jnp.bfloat16)
    p2b = p2f.astype(jnp.bfloat16)

    ls2, n2, mm2, mc2 = class_fix_loss(p1b, p2b, 0.95, tile_n=16)
    jax.block_until_ready((ls2, mm2, mc2))

    r_sum2, r_n2, r_mean2, r_cnt2 = _reference(
        p1b.astype(jnp.float32), p2b.astype(jnp.float32), 0.95)
    assert n2 == r_n2
    assert int(mc2) == r_cnt2
    # bf16 exp on the pred1 lse path -> slightly looser loss tolerance;
    # mask path stays in f32 so count/mean are exact.
    assert jnp.allclose(ls2, r_sum2, rtol=1e-2, atol=1e-2)
    assert jnp.allclose(mm2, r_mean2, rtol=1e-6, atol=1e-6)

    print("KERNEL_OK")
</pallas_src>

<mosaic_0001>
module attributes {stable_mosaic.version = 11 : i64} {
  func.func @_classfix_kernel(%arg0: i32, %arg1: memref<8x32xf32, #tpu.memory_space<vmem>>, %arg2: memref<8x32xf32, #tpu.memory_space<vmem>>, %arg3: memref<1x1x2xf32, #tpu.memory_space<vmem>>) attributes {dimension_semantics = [#tpu.dimension_semantics<parallel>], iteration_bounds = array<i64: 1>, scalar_prefetch = 0 : i64, scratch_operands = 0 : i64, tpu.core_type = #tpu.core_type<tc>, window_params = [{transform_indices = @transform_0, window_bounds = array<i64: 8, 32>}, {transform_indices = @transform_1, window_bounds = array<i64: 8, 32>}, {transform_indices = @transform_2, window_bounds = array<i64: 1, 1, 2>}]} {
    %c0 = arith.constant 0 : index
    %c0_0 = arith.constant 0 : index
    %0 = vector.load %arg1[%c0, %c0_0] : memref<8x32xf32, #tpu.memory_space<vmem>>, vector<8x32xf32>
    %c0_1 = arith.constant 0 : index
    %c0_2 = arith.constant 0 : index
    %1 = vector.load %arg2[%c0_1, %c0_2] : memref<8x32xf32, #tpu.memory_space<vmem>>, vector<8x32xf32>
    %2 = tpu.iota {dimensions = array<i32: 0>} : vector<8x1xi32>
    %c8_i32 = arith.constant 8 : i32
    %3 = arith.muli %arg0, %c8_i32 : i32
    %4 = vector.broadcast %3 : i32 to vector<8x1xi32>
    %5 = arith.addi %4, %2 : vector<8x1xi32>
    %c8_i32_3 = arith.constant 8 : i32
    %6 = vector.broadcast %c8_i32_3 : i32 to vector<8x1xi32>
    %7 = arith.cmpi slt, %5, %6 : vector<8x1xi32>
    %cst = arith.constant dense<0xFF800000> : vector<8xf32>
    %8 = vector.multi_reduction <maximumf>, %1, %cst [1] : vector<8x32xf32> to vector<8xf32>
    %9 = vector.shape_cast %8 : vector<8xf32> to vector<8x1xf32>
    %10 = vector.broadcast %9 : vector<8x1xf32> to vector<8x32xf32>
    %11 = arith.subf %1, %10 : vector<8x32xf32>
    %12 = math.exp %11 : vector<8x32xf32>
    %cst_4 = arith.constant dense<0.000000e+00> : vector<8xf32>
    %13 = vector.multi_reduction <add>, %12, %cst_4 [1] : vector<8x32xf32> to vector<8xf32>
    %14 = vector.shape_cast %13 : vector<8xf32> to vector<8x1xf32>
    %cst_5 = arith.constant 1.05263162 : f32
    %15 = vector.broadcast %cst_5 : f32 to vector<8x1xf32>
    %16 = arith.cmpf ole, %14, %15 : vector<8x1xf32>
    %17 = arith.andi %16, %7 : vector<8x1xi1>
    %cst_6 = arith.constant 1.000000e+00 : f32
    %cst_7 = arith.constant 0.000000e+00 : f32
    %18 = vector.broadcast %cst_6 : f32 to vector<8x1xf32>
    %19 = vector.broadcast %cst_7 : f32 to vector<8x1xf32>
    %20 = arith.select %17, %18, %19 : vector<8x1xi1>, vector<8x1xf32>
    %21 = tpu.iota {dimensions = array<i32: 1>} : vector<8x32xi32>
    %22 = vector.broadcast %9 : vector<8x1xf32> to vector<8x32xf32>
    %23 = arith.cmpf oeq, %1, %22 : vector<8x32xf32>
    %c32_i32 = arith.constant 32 : i32
    %24 = vector.broadcast %c32_i32 : i32 to vector<8x32xi32>
    %25 = arith.select %23, %21, %24 : vector<8x32xi1>, vector<8x32xi32>
    %cst_8 = arith.constant dense<2147483647> : vector<8xi32>
    %26 = vector.multi_reduction <minsi>, %25, %cst_8 [1] : vector<8x32xi32> to vector<8xi32>
    %27 = vector.shape_cast %26 : vector<8xi32> to vector<8x1xi32>
    %cst_9 = arith.constant dense<0xFF800000> : vector<8xf32>
    %28 = vector.multi_reduction <maximumf>, %0, %cst_9 [1] : vector<8x32xf32> to vector<8xf32>
    %29 = vector.shape_cast %28 : vector<8xf32> to vector<8x1xf32>
    %30 = vector.broadcast %29 : vector<8x1xf32> to vector<8x32xf32>
    %31 = arith.subf %0, %30 : vector<8x32xf32>
    %32 = math.exp %31 : vector<8x32xf32>
    %cst_10 = arith.constant dense<0.000000e+00> : vector<8xf32>
    %33 = vector.multi_reduction <add>, %32, %cst_10 [1] : vector<8x32xf32> to vector<8xf32>
    %34 = vector.shape_cast %33 : vector<8xf32> to vector<8x1xf32>
    %35 = math.log %34 : vector<8x1xf32>
    %36 = arith.addf %29, %35 : vector<8x1xf32>
    %37 = vector.broadcast %27 : vector<8x1xi32> to vector<8x32xi32>
    %38 = arith.cmpi eq, %21, %37 : vector<8x32xi32>
    %cst_11 = arith.constant 0.000000e+00 : f32
    %39 = vector.broadcast %cst_11 : f32 to vector<8x32xf32>
    %40 = arith.select %38, %0, %39 : vector<8x32xi1>, vector<8x32xf32>
    %cst_12 = arith.constant dense<0.000000e+00> : vector<8xf32>
    %41 = vector.multi_reduction <add>, %40, %cst_12 [1] : vector<8x32xf32> to vector<8xf32>
    %42 = vector.shape_cast %41 : vector<8xf32> to vector<8x1xf32>
    %43 = arith.subf %36, %42 : vector<8x1xf32>
    %44 = arith.mulf %43, %20 : vector<8x1xf32>
    %cst_13 = arith.constant 0.000000e+00 : f32
    %45 = vector.broadcast %cst_13 : f32 to vector<8x1xf32>
    %46 = arith.select %7, %44, %45 : vector<8x1xi1>, vector<8x1xf32>
    %47 = tpu.iota {dimensions = array<i32: 2>} : vector<1x1x2xi32>
    %c0_i32 = arith.constant 0 : i32
    %48 = vector.broadcast %c0_i32 : i32 to vector<1x1x2xi32>
    %49 = arith.cmpi eq, %47, %48 : vector<1x1x2xi32>
    %50 = vector.shape_cast %46 : vector<8x1xf32> to vector<1x8x1xf32>
    %cst_14 = arith.constant dense<0.000000e+00> : vector<1xf32>
    %51 = vector.multi_reduction <add>, %50, %cst_14 [1, 2] : vector<1x8x1xf32> to vector<1xf32>
    %52 = vector.shape_cast %51 : vector<1xf32> to vector<1x1x1xf32>
    %53 = vector.extract %52[0, 0, 0] : f32 from vector<1x1x1xf32>
    %54 = vector.shape_cast %20 : vector<8x1xf32> to vector<1x8x1xf32>
    %cst_15 = arith.constant dense<0.000000e+00> : vector<1xf32>
    %55 = vector.multi_reduction <add>, %54, %cst_15 [1, 2] : vector<1x8x1xf32> to vector<1xf32>
    %56 = vector.shape_cast %55 : vector<1xf32> to vector<1x1x1xf32>
    %57 = vector.extract %56[0, 0, 0] : f32 from vector<1x1x1xf32>
    %58 = vector.broadcast %53 : f32 to vector<1x1x2xf32>
    %59 = vector.broadcast %57 : f32 to vector<1x1x2xf32>
    %60 = arith.select %49, %58, %59 : vector<1x1x2xi1>, vector<1x1x2xf32>
    %c0_16 = arith.constant 0 : index
    %c0_17 = arith.constant 0 : index
    %c0_18 = arith.constant 0 : index
    %61 = vector.load %arg3[%c0_16, %c0_17, %c0_18] : memref<1x1x2xf32, #tpu.memory_space<vmem>>, vector<1x1x2xf32>
    tpu.vector_store %arg3[%c0_16, %c0_17, %c0_18], %60 {strides = array<i32>} : memref<1x1x2xf32, #tpu.memory_space<vmem>>, vector<1x1x2xf32>,
    return
  }
  func.func @transform_0(%arg0: i32) -> (i32, i32) {
    %c0_i32 = arith.constant 0 : i32
    %c0_i32_0 = arith.constant 0 : i32
    return %arg0, %c0_i32 : i32, i32
  }
  func.func @transform_1(%arg0: i32) -> (i32, i32) {
    %c0_i32 = arith.constant 0 : i32
    %c0_i32_0 = arith.constant 0 : i32
    return %arg0, %c0_i32 : i32, i32
  }
  func.func @transform_2(%arg0: i32) -> (i32, i32, i32) {
    %c0_i32 = arith.constant 0 : i32
    %c0_i32_0 = arith.constant 0 : i32
    %c0_i32_1 = arith.constant 0 : i32
    return %arg0, %c0_i32, %c0_i32_0 : i32, i32, i32
  }
}

</mosaic_0001>

<bundles_post_ra>
// kernel: tpu_custom_call.1
= control target key start
LH: loop header
LB: loop body
LE: loop exit
PB: predicated region body
PF: predicated region fallthrough
CT: control target
= control target key end

     0   :  { %7 = vsyncpa [#allocation3], 0  ;;  %s278_s0 = inlined_call_operand.hbm [shape: f32[8,32], index: 0, kind: input, shape index: {}]   ;;  %s279_s1 = inlined_call_operand.hbm [shape: f32[8,32], index: 1, kind: input, shape index: {}]   ;;  %s280_s2 = inlined_call_operand.hbm [shape: f32[1,1,2], index: 2, kind: output, shape index: {}]  }
   0x1   :  { %8 = vsyncpa [#allocation6], 0 }
   0x2   :  { %9 = vsyncpa [#allocation4], 0  ;;  %s15_s11 = sshll.u32 %s278_s0, 4  ;;  %s237_s12 = smov [#allocation2]   ;;  %s16_s11 = int_to_ptr.hbm [resolvable:$true] %s15_s11 }
   0x3   :  { %s17_s13 = sshll.u32 %s237_s12, 4  ;;  %s26_s16 = sshll.u32 %s279_s1, 4  ;;  %s18_s13 = int_to_ptr.vmem [resolvable:$true] %s17_s13  ;;  %s27_s16 = int_to_ptr.hbm [resolvable:$true] %s26_s16 }
   0x4   :  { %20 = dma.hbm_to_vmem [thread:$0]  %s16_s11, 128, %s18_s13, [#allocation3]  }
   0x5   :  { %s238_s17 = smov [#allocation5]  }
   0x6   :  { %s28_s18 = sshll.u32 %s238_s17, 4  ;;  %s29_s18 = int_to_ptr.vmem [resolvable:$true] %s28_s18 }
   0x7   :  { %31 = dma.hbm_to_vmem [thread:$0]  %s27_s16, 128, %s29_s18, [#allocation6]  }
   0x8   :  { %231 = dma.done.wait [#allocation3], 128  }
   0x9   :  { %232 = vsyncadd [#allocation3], 4294967168 }
   0xa   :  { %233 = dma.done.wait [#allocation6], 128  }
   0xb   :  { %234 = vsyncadd [#allocation6], 4294967168  ;;  %vm48_vm0 = vcmask 261120   ;;  %v41_v0 = vld [vmem:[#allocation5] sm:$0xff]  ;;  %v40_v1 = vld [vmem:[#allocation2] sm:$0xff]  ;;  %v61_v4 = vlaneseq  ;;  %vm101_vm3 = vcmask 7168  }
   0xc   :  { %v49_v2 = vsel %vm48_vm0, %v41_v0, -inf  ;;  %v80_v3 = vsel %vm48_vm0, %v40_v1, -inf  ;;  %v239_v26 = vmov 0.0   ;;  %s240_s0 = smov [#allocation7]   ;;  %s134_s21 = sshll.u32 %s280_s2, 4  ;;  %vm125_vm7 = vcmask 8192   ;;  %s135_s21 = int_to_ptr.hbm [resolvable:$true] %s134_s21 }
   0xd   :  { %50 = vmax.xlane.f32.xlu0 %v49_v2  ;;  %81 = vmax.xlane.f32.xlu1 %v80_v3  ;;  %v264_v5 = vand.u32 127, %v61_v4  ;;  %s132_s1 = sshll.u32 %s240_s0, 4  ;;  %s133_s1 = int_to_ptr.vmem [resolvable:$true] %s132_s1 }
   0xf   :  { %vm100_vm6 = vcmp.eq.s32.totalorder %v264_v5, 0 }
  0x80   :  { %v51_v6 = vpop.xlane.xlu0 %50  ;;  %v82_v7 = vpop.xlane.xlu1 %81 }
  0x81   :  { %vm63_vm1 = vcmp.eq.f32.partialorder %v41_v0, %v51_v6  ;;  %v83_v8 = vsub.f32 %v40_v1, %v82_v7  ;;  %v52_v12 = vsub.f32 %v41_v0, %v51_v6 }
  0x82   :  { %v64_v9 = vsel %vm63_vm1, %v264_v5, 32 }
  0x83   :  { %v84_v10 = vmul.f32 1.442695, %v83_v8  ;;  %v65_v11 = vsel %vm48_vm0, %v64_v9, 2147483647  ;;  %v53_v15 = vmul.f32 1.442695, %v52_v12 }
  0x84   :  { %v67_v13 = vshra.s32 %v65_v11, 16  ;;  %v66_v20 = vand.u32 65535, %v65_v11 }
  0x85   :  { %153 = vpow2.f32 %v84_v10 }
  0x86   :  { %v69_v14 = vcvt.s32.f32 %v67_v13  ;;  %155 = vpow2.f32 %v53_v15  ;;  %v68_v22 = vcvt.s32.f32 %v66_v20 }
  0x88   :  { %70 = vmin.xlane.f32.xlu0 %v69_v14 }
  0x8b   :  { %v154_v16 = vpop.eup %153 }
  0x8c   :  { %v86_v17 = vsel %vm48_vm0, %v154_v16, 0.0  ;;  %v156_v18 = vpop.eup %155 }
  0x8d   :  { %87 = vadd.xlane.f32.xlu2 %v86_v17  ;;  %v55_v19 = vsel %vm48_vm0, %v156_v18, 0.0 }
  0x95   :  { %56 = vadd.xlane.f32.xlu2 %v55_v19 }
  0xfb   :  { %v71_v21 = vpop.xlane.xlu0 %70 }
  0xfc   :  { %vm72_vm2 = vcmp.eq.f32.partialorder %v69_v14, %v71_v21  ;;  %v77_v29 = vcvt.f32.s32 %v71_v21 }
  0xfd   :  { %v73_v23 = vsel %vm72_vm2, %v68_v22, inf }
  0xfe   :  { %74 = vmin.xlane.f32.xlu1 %v73_v23  ;;  %v78_v31 = vshll.u32 %v77_v29, 16 }
 0x100   :  { %v88_v24 = vpop.xlane.xlu2 %87 }
 0x101   :  { %157 = vlog2.f32 %v88_v24 }
 0x107   :  { %v158_v36 = vpop.eup %157 }
 0x108   :  { %v57_v25 = vpop.xlane.xlu2 %56  ;;  %v90_v37 = vmul.f32 0.6931472, %v158_v36 }
 0x109   :  { %vm58_vm4 = vcmp.le.f32.partialorder %v57_v25, 1.0526316 }
 0x10a   :  { %v60_v27 = vsel %vm58_vm4, 1.0, %v239_v26  ;;  %v91_v38 = vadd.f32 %v90_v37, %v82_v7 }
 0x10b   :  { %v112_v28 = vsel %vm101_vm3, %v60_v27, 0.0 }
 0x10c   :  { %113 = vadd.xlane.f32.xlu2 %v112_v28 }
 0x171   :  { %v75_v30 = vpop.xlane.xlu1 %74 }
 0x172   :  { %v76_v32 = vcvt.f32.s32 %v75_v30 }
 0x174   :  { %v79_v33 = vadd.s32 %v78_v31, %v76_v32 }
 0x176   :  { %vm92_vm5 = vcmp.eq.s32.totalorder %v264_v5, %v79_v33 }
 0x177   :  { %v93_v34 = vsel %vm92_vm5, %v40_v1, 0.0 }
 0x178   :  { %v94_v35 = vsel %vm48_vm0, %v93_v34, 0.0 }
 0x179   :  { %95 = vadd.xlane.f32.xlu0 %v94_v35 }
 0x17f   :  { %v114_v43 = vpop.xlane.xlu2 %113 }
 0x180   :  { %v115_v44 = vrot.slane %v114_v43, 4 }
 0x182   :  { %v116_v45 = vadd.f32 %v115_v44, %v114_v43 }
 0x184   :  { %v117_v46 = vrot.slane %v116_v45, 2 }
 0x186   :  { %v118_v50 = vadd.f32 %v117_v46, %v116_v45 }
 0x188   :  { %v119_v53 = vrot.slane %v118_v50, 1 }
 0x18a   :  { %v120_v56 = vadd.f32 %v119_v53, %v118_v50 }
 0x1ec   :  { %v96_v39 = vpop.xlane.xlu0 %95 }
 0x1ed   :  { %v97_v40 = vsub.f32 %v91_v38, %v96_v39 }
 0x1ef   :  { %v98_v41 = vmul.f32 %v97_v40, %v60_v27 }
 0x1f1   :  { %v102_v42 = vsel %vm101_vm3, %v98_v41, 0.0 }
 0x1f2   :  { %103 = vadd.xlane.f32.xlu1 %v102_v42 }
 0x265   :  { %v104_v47 = vpop.xlane.xlu1 %103 }
 0x266   :  { %v105_v48 = vrot.slane %v104_v47, 4 }
 0x268   :  { %v106_v49 = vadd.f32 %v105_v48, %v104_v47 }
 0x26a   :  { %v107_v51 = vrot.slane %v106_v49, 2 }
 0x26c   :  { %v108_v52 = vadd.f32 %v107_v51, %v106_v49 }
 0x26e   :  { %v109_v54 = vrot.slane %v108_v52, 1 }
 0x270   :  { %v110_v55 = vadd.f32 %v109_v54, %v108_v52 }
 0x272   :  { %145 = vpush %v110_v55 }
 0x273   :  { %147 = vpush %v120_v56 }
 0x2a3   :  { %s146_s22 = spop %145 }
 0x2a4   :  { %v122_v57 = vstv %s146_s22  ;;  %s148_s23 = spop %147 }
 0x2a5   :  { %v123_v58 = vstv %s148_s23 }
 0x2a6   :  { %v124_v59 = vsel %vm100_vm6, %v122_v57, %v123_v58 }
 0x2a7   :  { %126 = vst.msk [vmem:[#allocation7] sm:$0x1] %vm125_vm7, %v124_v59 }
 0x2a8   :  { %137 = dma.vmem_to_hbm [thread:$0]  %s133_s1, 16, %s135_s21, [#allocation4]  }
 0x2a9   :  { %235 = dma.done.wait [#allocation4], 16  }
 0x2aa   :  { %236 = vsyncadd [#allocation4], 4294967280 }
 0x2ab   :  { %142 = vsyncpa [#allocation3], 1 }
 0x2ac   :  { %143 = vsyncpa [#allocation6], 1 }
 0x2ad   :  { %144 = vsyncpa [#allocation4], 1 }

</bundles_post_ra>
